<compile_context>
chip_gen: v7x
topology: tpu7x:2x2x1
jax: 0.10.0
libtpu: 0.0.40
codegen_flags: <defaults>
</compile_context>

<pallas_src>
import jax
import jax.numpy as jnp
from jax.experimental import pallas as pl
from jax.experimental.pallas import tpu as pltpu


def _round_up(n, m):
    return ((n + m - 1) // m) * m


_MIN_TB = 16     # bf16 vregs pack (16, 128): keep batch tiles multiples of 16
_MAX_TB = 512    # mem-bound tiling sweet spot (~85% of HBM roofline)


# ---------------------------------------------------------------------------
# Kernel
# ---------------------------------------------------------------------------
def vae_forward_kernel(
    x_ref, eps_ref,
    w_enc_ref, w_mulv_ref, w_dec_ref, w_out_ref,
    b_ref,
    recon_ref, mulv_ref,
):
    Hp = w_enc_ref.shape[1]
    L2 = w_mulv_ref.shape[1]      # packed [mu | logvar] lane width (multiple of 128)
    Lh = L2 // 2                  # per-head lane width
    Dp = w_out_ref.shape[1]

    # static, 128-aligned lane slices of the packed bias vector
    b_enc = b_ref[:, 0:Hp]
    b_mulv = b_ref[:, Hp:Hp + L2]
    b_dec = b_ref[:, Hp + L2:2 * Hp + L2]
    b_out = b_ref[:, 2 * Hp + L2:2 * Hp + L2 + Dp]

    # encoder: Linear + ReLU (bf16 MXU inputs, f32 accumulation, f32 elementwise)
    h = jnp.dot(x_ref[...], w_enc_ref[...],
                preferred_element_type=jnp.float32) + b_enc
    h = jnp.maximum(h, 0.0)

    # fused latent heads: [mu | logvar] packed into a single L2-lane block
    mulv = jnp.dot(h.astype(jnp.bfloat16), w_mulv_ref[...],
                   preferred_element_type=jnp.float32) + b_mulv
    mulv_ref[...] = mulv

    # reparameterization without sub-128-lane slicing:
    #   eps_ref carries eps in the logvar lanes [Lh, 2Lh) and zeros elsewhere, so
    #   t = exp(0.5*mulv)*eps is std*eps in the logvar lanes and 0 in the mu lanes;
    #   an XLU roll by Lh drops std*eps under the mu lanes -> z lives in [0, Lh).
    eps_f = eps_ref[...].astype(jnp.float32)
    t = jnp.where(eps_f == 0.0, 0.0, jnp.exp(0.5 * mulv) * eps_f)  # guards inf*0
    z = mulv + pltpu.roll(t, shift=Lh, axis=1)
    # lanes [Lh, 2Lh) of z still hold logvar; the matching w_dec rows are zero.

    # decoder: Linear + ReLU, output Linear + sigmoid
    hd = jnp.dot(z.astype(jnp.bfloat16), w_dec_ref[...],
                 preferred_element_type=jnp.float32) + b_dec
    hd = jnp.maximum(hd, 0.0)
    logits = jnp.dot(hd.astype(jnp.bfloat16), w_out_ref[...],
                     preferred_element_type=jnp.float32) + b_out

    # exact sigmoid as a single EUP op; store recon in bf16 (halves writeback)
    recon_ref[...] = (0.5 * (jnp.tanh(0.5 * logits) + 1.0)).astype(recon_ref.dtype)


# ---------------------------------------------------------------------------
# Host-side packing / wrapper
# ---------------------------------------------------------------------------
def _pad2(a, rows, cols):
    return jnp.pad(a, ((0, rows - a.shape[0]), (0, cols - a.shape[1])))


def pack_params(params):
    """Pad dims to lane-friendly sizes, fuse mu/lv heads, pack biases.

    Call once per parameter set (hoisted out of the forward pass).
    """
    D, H = params["w_enc"].shape
    L = params["w_mu"].shape[1]
    Dp, Hp = _round_up(D, 128), _round_up(H, 128)
    # pack [mu | logvar] into a single 128-lane block when L <= 64
    Lh = 64 if L <= 64 else _round_up(L, 128)
    L2 = 2 * Lh

    w_enc = _pad2(params["w_enc"], Dp, Hp).astype(jnp.bfloat16)
    w_mulv = jnp.concatenate(
        [_pad2(params["w_mu"], Hp, Lh), _pad2(params["w_lv"], Hp, Lh)],
        axis=1).astype(jnp.bfloat16)
    # decoder contracts over the packed latent block; rows [L, 2Lh) are zero so
    # the logvar lanes carried inside z contribute nothing.
    w_dec = _pad2(params["w_dec"], L2, Hp).astype(jnp.bfloat16)
    w_out = _pad2(params["w_out"], Hp, Dp).astype(jnp.bfloat16)

    b_all = jnp.concatenate(
        [_pad2(params["b_enc"], 1, Hp),
         _pad2(params["b_mu"], 1, Lh), _pad2(params["b_lv"], 1, Lh),
         _pad2(params["b_dec"], 1, Hp),
         _pad2(params["b_out"], 1, Dp)],
        axis=1).astype(jnp.float32)

    return dict(w_enc=w_enc, w_mulv=w_mulv, w_dec=w_dec, w_out=w_out,
                b_all=b_all, dims=(D, H, L, Dp, Hp, Lh))


def _choose_tb(B):
    n_steps = max(pl.cdiv(B, _MAX_TB), 1)
    # v7x has 2 TensorCores; give a "parallel" batch grid >= 2 steps whenever the
    # tiles stay reasonably large. Negligible cost on v5e/v6e (1 TC).
    if n_steps < 2 and B >= 8 * _MIN_TB:
        n_steps = 2
    return _round_up(pl.cdiv(B, n_steps), _MIN_TB)


def vae_forward(x, eps, packed, *, tb=None):
    """Fused VAE forward on pre-packed parameters.

    Returns (reconstruction, mu, logvar). `mu` is exactly what
    VaeBaseModel.get_latent(x) returns.
    """
    D, H, L, Dp, Hp, Lh = packed["dims"]
    L2 = 2 * Lh
    B = x.shape[0]

    if tb is None:
        tb = _choose_tb(B)
    B_pad = _round_up(B, tb)
    grid = (B_pad // tb,)

    x_p = _pad2(x, B_pad, Dp).astype(jnp.bfloat16)
    # eps ships in bf16 and sits in the logvar lanes [Lh, Lh+L) of the packed block
    eps_p = jnp.pad(eps, ((0, B_pad - B), (Lh, L2 - Lh - L))).astype(jnp.bfloat16)

    w_enc, w_mulv, w_dec, w_out, b_all = (
        packed["w_enc"], packed["w_mulv"], packed["w_dec"],
        packed["w_out"], packed["b_all"])

    # --- VMEM budget ---------------------------------------------------------
    # Pallas double-buffers every input (even constant-index_map ones), so count
    # weights twice.  (pl.Buffered(1) on the resident specs would halve this; we
    # keep the conservative accounting for compile robustness.)
    bytes_weights = 2 * (2 * (w_enc.size + w_mulv.size + w_dec.size + w_out.size)
                         + 4 * b_all.size)
    bytes_tiles = 2 * tb * (2 * Dp + 2 * L2 + 2 * Dp + 4 * L2)   # x, eps, recon, mulv
    bytes_interm = 4 * tb * (2 * Hp + 3 * L2 + Dp)               # h, hd, mulv/t/z, logits
    budget = bytes_weights + bytes_tiles + bytes_interm + (4 << 20)
    try:
        vmem_cap = pltpu.get_tpu_info().vmem_capacity_bytes      # 64 MiB v7x, 128 MiB v5e/v6e
    except Exception:  # pragma: no cover - conservative fallback
        vmem_cap = 64 << 20
    vmem_limit = int(min(max(budget, 16 << 20), max(vmem_cap - (16 << 20), 32 << 20)))

    # --- cost estimate so XLA can schedule around the kernel ------------------
    flops = 2 * B_pad * (Dp * Hp + Hp * L2 + L2 * Hp + Hp * Dp)
    transcendentals = B_pad * (L2 + Dp)
    bytes_accessed = (x_p.size * 2 + eps_p.size * 2
                      + 2 * (w_enc.size + w_mulv.size + w_dec.size + w_out.size)
                      + 4 * b_all.size
                      + B_pad * Dp * 2 + B_pad * L2 * 4)

    const_map = lambda i: (0, 0)
    recon_p, mulv_p = pl.pallas_call(
        vae_forward_kernel,
        grid=grid,
        in_specs=[
            pl.BlockSpec((tb, Dp), lambda i: (i, 0)),        # x tile (bf16)
            pl.BlockSpec((tb, L2), lambda i: (i, 0)),        # eps tile (bf16, lv lanes)
            pl.BlockSpec((Dp, Hp), const_map),               # w_enc    (VMEM-resident)
            pl.BlockSpec((Hp, L2), const_map),               # w_mu|lv  (VMEM-resident)
            pl.BlockSpec((L2, Hp), const_map),               # w_dec    (VMEM-resident)
            pl.BlockSpec((Hp, Dp), const_map),               # w_out    (VMEM-resident)
            pl.BlockSpec((1, 2 * Hp + L2 + Dp), const_map),  # packed biases
        ],
        out_specs=(
            pl.BlockSpec((tb, Dp), lambda i: (i, 0)),        # recon tile (bf16)
            pl.BlockSpec((tb, L2), lambda i: (i, 0)),        # [mu | logvar] slab (f32)
        ),
        out_shape=(
            jax.ShapeDtypeStruct((B_pad, Dp), jnp.bfloat16),
            jax.ShapeDtypeStruct((B_pad, L2), jnp.float32),
        ),
        compiler_params=pltpu.CompilerParams(
            dimension_semantics=("parallel",),
            vmem_limit_bytes=vmem_limit,
        ),
        cost_estimate=pl.CostEstimate(
            flops=flops, transcendentals=transcendentals,
            bytes_accessed=bytes_accessed),
    )(x_p, eps_p, w_enc, w_mulv, w_dec, w_out, b_all)

    recon = recon_p[:B, :D].astype(jnp.float32)
    mu = mulv_p[:B, :L]
    logvar = mulv_p[:B, Lh:Lh + L]
    return recon, mu, logvar


# ---------------------------------------------------------------------------
# Parameters / reference
# ---------------------------------------------------------------------------
def init_params(key, d_in, hidden, latent):
    """Deterministic synthetic parameter init (no checkpoint loading)."""
    ks = jax.random.split(key, 5)

    def lin(k, fan_in, fan_out):
        w = jax.random.normal(k, (fan_in, fan_out), jnp.float32) / jnp.sqrt(fan_in)
        b = jnp.zeros((1, fan_out), jnp.float32)
        return w, b

    w_enc, b_enc = lin(ks[0], d_in, hidden)
    w_mu, b_mu = lin(ks[1], hidden, latent)
    w_lv, b_lv = lin(ks[2], hidden, latent)
    w_dec, b_dec = lin(ks[3], latent, hidden)
    w_out, b_out = lin(ks[4], hidden, d_in)
    return dict(w_enc=w_enc, b_enc=b_enc, w_mu=w_mu, b_mu=b_mu,
                w_lv=w_lv, b_lv=b_lv, w_dec=w_dec, b_dec=b_dec,
                w_out=w_out, b_out=b_out)


def reference_forward(x, eps, p):
    h = jnp.maximum(x @ p["w_enc"] + p["b_enc"], 0.0)
    mu = h @ p["w_mu"] + p["b_mu"]
    logvar = h @ p["w_lv"] + p["b_lv"]
    z = mu + jnp.exp(0.5 * logvar) * eps
    hd = jnp.maximum(z @ p["w_dec"] + p["b_dec"], 0.0)
    recon = jax.nn.sigmoid(hd @ p["w_out"] + p["b_out"])
    return recon, mu, logvar


if __name__ == "__main__":
    B, D_IN, HIDDEN, LATENT = 8, 64, 32, 16

    key = jax.random.PRNGKey(0)
    k_x, k_eps, k_p = jax.random.split(key, 3)

    x = jax.random.normal(k_x, (B, D_IN), jnp.float32)
    eps = jax.random.normal(k_eps, (B, LATENT), jnp.float32)
    params = init_params(k_p, D_IN, HIDDEN, LATENT)

    packed = pack_params(params)            # packed once, reused for every forward
    recon, mu, logvar = vae_forward(x, eps, packed)
    jax.block_until_ready((recon, mu, logvar))

    # correctness check against pure-JAX f32 reference (bf16 matmuls / bf16 eps /
    # bf16 recon store in the kernel -> loose tolerance)
    r_ref, mu_ref, lv_ref = reference_forward(x, eps, params)
    assert jnp.allclose(recon, r_ref, atol=5e-2, rtol=5e-2)
    assert jnp.allclose(mu, mu_ref, atol=5e-2, rtol=5e-2)
    assert jnp.allclose(logvar, lv_ref, atol=5e-2, rtol=5e-2)

    # get_latent semantics: latent mean of the encoded input
    latent = mu
    jax.block_until_ready(latent)

    # TODO(synk): loss_fn / get_params are abstract in the PyTorch base class
    # (no concrete compute to translate).

    print("KERNEL_OK")
</pallas_src>

<mosaic_0001>
module attributes {stable_mosaic.version = 11 : i64} {
  func.func @vae_forward_kernel(%arg0: i32, %arg1: memref<16x128xbf16, #tpu.memory_space<vmem>>, %arg2: memref<16x128xbf16, #tpu.memory_space<vmem>>, %arg3: memref<128x128xbf16, #tpu.memory_space<vmem>>, %arg4: memref<128x128xbf16, #tpu.memory_space<vmem>>, %arg5: memref<128x128xbf16, #tpu.memory_space<vmem>>, %arg6: memref<128x128xbf16, #tpu.memory_space<vmem>>, %arg7: memref<1x512xf32, #tpu.memory_space<vmem>>, %arg8: memref<16x128xbf16, #tpu.memory_space<vmem>>, %arg9: memref<16x128xf32, #tpu.memory_space<vmem>>) attributes {dimension_semantics = [#tpu.dimension_semantics<parallel>], iteration_bounds = array<i64: 1>, scalar_prefetch = 0 : i64, scratch_operands = 0 : i64, tpu.core_type = #tpu.core_type<tc>, window_params = [{transform_indices = @transform_0, window_bounds = array<i64: 16, 128>}, {transform_indices = @transform_1, window_bounds = array<i64: 16, 128>}, {pipeline_mode = #tpu.pipeline_mode<synchronous>, transform_indices = @transform_2, window_bounds = array<i64: 128, 128>}, {pipeline_mode = #tpu.pipeline_mode<synchronous>, transform_indices = @transform_3, window_bounds = array<i64: 128, 128>}, {pipeline_mode = #tpu.pipeline_mode<synchronous>, transform_indices = @transform_4, window_bounds = array<i64: 128, 128>}, {pipeline_mode = #tpu.pipeline_mode<synchronous>, transform_indices = @transform_5, window_bounds = array<i64: 128, 128>}, {pipeline_mode = #tpu.pipeline_mode<synchronous>, transform_indices = @transform_6, window_bounds = array<i64: 1, 512>}, {transform_indices = @transform_7, window_bounds = array<i64: 16, 128>}, {transform_indices = @transform_8, window_bounds = array<i64: 16, 128>}]} {
    %c0 = arith.constant 0 : index
    %c0_0 = arith.constant 0 : index
    %0 = vector.load %arg7[%c0, %c0_0] : memref<1x512xf32, #tpu.memory_space<vmem>>, vector<1x128xf32>
    %c0_1 = arith.constant 0 : index
    %c128 = arith.constant 128 : index
    %1 = vector.load %arg7[%c0_1, %c128] : memref<1x512xf32, #tpu.memory_space<vmem>>, vector<1x128xf32>
    %c0_2 = arith.constant 0 : index
    %c256 = arith.constant 256 : index
    %2 = vector.load %arg7[%c0_2, %c256] : memref<1x512xf32, #tpu.memory_space<vmem>>, vector<1x128xf32>
    %c0_3 = arith.constant 0 : index
    %c384 = arith.constant 384 : index
    %3 = vector.load %arg7[%c0_3, %c384] : memref<1x512xf32, #tpu.memory_space<vmem>>, vector<1x128xf32>
    %c0_4 = arith.constant 0 : index
    %c0_5 = arith.constant 0 : index
    %4 = vector.load %arg1[%c0_4, %c0_5] : memref<16x128xbf16, #tpu.memory_space<vmem>>, vector<16x128xbf16>
    %c0_6 = arith.constant 0 : index
    %c0_7 = arith.constant 0 : index
    %5 = vector.load %arg3[%c0_6, %c0_7] : memref<128x128xbf16, #tpu.memory_space<vmem>>, vector<128x128xbf16>
    %cst = arith.constant dense<0.000000e+00> : vector<16x128xf32>
    %6 = tpu.matmul %4, %5, %cst {dimension_numbers = #tpu.dot_dimension_numbers<[1], [0], [0], [1], [0, 0, 1, 1], [], []>} : vector<16x128xbf16>, vector<128x128xbf16>, vector<16x128xf32> -> vector<16x128xf32>
    %7 = vector.broadcast %0 : vector<1x128xf32> to vector<16x128xf32>
    %8 = arith.addf %6, %7 : vector<16x128xf32>
    %cst_8 = arith.constant 0.000000e+00 : f32
    %9 = vector.broadcast %cst_8 : f32 to vector<16x128xf32>
    %10 = arith.maximumf %8, %9 : vector<16x128xf32>
    %11 = arith.truncf %10 : vector<16x128xf32> to vector<16x128xbf16>
    %c0_9 = arith.constant 0 : index
    %c0_10 = arith.constant 0 : index
    %12 = vector.load %arg4[%c0_9, %c0_10] : memref<128x128xbf16, #tpu.memory_space<vmem>>, vector<128x128xbf16>
    %cst_11 = arith.constant dense<0.000000e+00> : vector<16x128xf32>
    %13 = tpu.matmul %11, %12, %cst_11 {dimension_numbers = #tpu.dot_dimension_numbers<[1], [0], [0], [1], [0, 0, 1, 1], [], []>} : vector<16x128xbf16>, vector<128x128xbf16>, vector<16x128xf32> -> vector<16x128xf32>
    %14 = vector.broadcast %1 : vector<1x128xf32> to vector<16x128xf32>
    %15 = arith.addf %13, %14 : vector<16x128xf32>
    %c0_12 = arith.constant 0 : index
    %c0_13 = arith.constant 0 : index
    %16 = vector.load %arg9[%c0_12, %c0_13] : memref<16x128xf32, #tpu.memory_space<vmem>>, vector<16x128xf32>
    tpu.vector_store %arg9[%c0_12, %c0_13], %15 {strides = array<i32>} : memref<16x128xf32, #tpu.memory_space<vmem>>, vector<16x128xf32>,
    %c0_14 = arith.constant 0 : index
    %c0_15 = arith.constant 0 : index
    %17 = vector.load %arg2[%c0_14, %c0_15] : memref<16x128xbf16, #tpu.memory_space<vmem>>, vector<16x128xbf16>
    %18 = arith.extf %17 : vector<16x128xbf16> to vector<16x128xf32>
    %cst_16 = arith.constant 0.000000e+00 : f32
    %19 = vector.broadcast %cst_16 : f32 to vector<16x128xf32>
    %20 = arith.cmpf oeq, %18, %19 : vector<16x128xf32>
    %cst_17 = arith.constant 5.000000e-01 : f32
    %21 = vector.broadcast %cst_17 : f32 to vector<16x128xf32>
    %22 = arith.mulf %21, %15 : vector<16x128xf32>
    %23 = math.exp %22 : vector<16x128xf32>
    %24 = arith.mulf %23, %18 : vector<16x128xf32>
    %cst_18 = arith.constant 0.000000e+00 : f32
    %25 = vector.broadcast %cst_18 : f32 to vector<16x128xf32>
    %26 = arith.select %20, %25, %24 : vector<16x128xi1>, vector<16x128xf32>
    %c64_i32 = arith.constant 64 : i32
    %27 = tpu.dynamic_rotate %26 by %c64_i32 dim 1 : vector<16x128xf32>, i32 -> vector<16x128xf32>
    %28 = arith.addf %15, %27 : vector<16x128xf32>
    %29 = arith.truncf %28 : vector<16x128xf32> to vector<16x128xbf16>
    %c0_19 = arith.constant 0 : index
    %c0_20 = arith.constant 0 : index
    %30 = vector.load %arg5[%c0_19, %c0_20] : memref<128x128xbf16, #tpu.memory_space<vmem>>, vector<128x128xbf16>
    %cst_21 = arith.constant dense<0.000000e+00> : vector<16x128xf32>
    %31 = tpu.matmul %29, %30, %cst_21 {dimension_numbers = #tpu.dot_dimension_numbers<[1], [0], [0], [1], [0, 0, 1, 1], [], []>} : vector<16x128xbf16>, vector<128x128xbf16>, vector<16x128xf32> -> vector<16x128xf32>
    %32 = vector.broadcast %2 : vector<1x128xf32> to vector<16x128xf32>
    %33 = arith.addf %31, %32 : vector<16x128xf32>
    %cst_22 = arith.constant 0.000000e+00 : f32
    %34 = vector.broadcast %cst_22 : f32 to vector<16x128xf32>
    %35 = arith.maximumf %33, %34 : vector<16x128xf32>
    %36 = arith.truncf %35 : vector<16x128xf32> to vector<16x128xbf16>
    %c0_23 = arith.constant 0 : index
    %c0_24 = arith.constant 0 : index
    %37 = vector.load %arg6[%c0_23, %c0_24] : memref<128x128xbf16, #tpu.memory_space<vmem>>, vector<128x128xbf16>
    %cst_25 = arith.constant dense<0.000000e+00> : vector<16x128xf32>
    %38 = tpu.matmul %36, %37, %cst_25 {dimension_numbers = #tpu.dot_dimension_numbers<[1], [0], [0], [1], [0, 0, 1, 1], [], []>} : vector<16x128xbf16>, vector<128x128xbf16>, vector<16x128xf32> -> vector<16x128xf32>
    %39 = vector.broadcast %3 : vector<1x128xf32> to vector<16x128xf32>
    %40 = arith.addf %38, %39 : vector<16x128xf32>
    %cst_26 = arith.constant 5.000000e-01 : f32
    %41 = vector.broadcast %cst_26 : f32 to vector<16x128xf32>
    %42 = arith.mulf %41, %40 : vector<16x128xf32>
    %43 = math.tanh %42 : vector<16x128xf32>
    %cst_27 = arith.constant 1.000000e+00 : f32
    %44 = vector.broadcast %cst_27 : f32 to vector<16x128xf32>
    %45 = arith.addf %43, %44 : vector<16x128xf32>
    %cst_28 = arith.constant 5.000000e-01 : f32
    %46 = vector.broadcast %cst_28 : f32 to vector<16x128xf32>
    %47 = arith.mulf %46, %45 : vector<16x128xf32>
    %48 = arith.truncf %47 : vector<16x128xf32> to vector<16x128xbf16>
    %c0_29 = arith.constant 0 : index
    %c0_30 = arith.constant 0 : index
    %49 = vector.load %arg8[%c0_29, %c0_30] : memref<16x128xbf16, #tpu.memory_space<vmem>>, vector<16x128xbf16>
    tpu.vector_store %arg8[%c0_29, %c0_30], %48 {strides = array<i32>} : memref<16x128xbf16, #tpu.memory_space<vmem>>, vector<16x128xbf16>,
    return
  }
  func.func @transform_0(%arg0: i32) -> (i32, i32) {
    %c0_i32 = arith.constant 0 : i32
    %c0_i32_0 = arith.constant 0 : i32
    return %arg0, %c0_i32 : i32, i32
  }
  func.func @transform_1(%arg0: i32) -> (i32, i32) {
    %c0_i32 = arith.constant 0 : i32
    %c0_i32_0 = arith.constant 0 : i32
    return %arg0, %c0_i32 : i32, i32
  }
  func.func @transform_2(%arg0: i32) -> (i32, i32) {
    %c0_i32 = arith.constant 0 : i32
    %c0_i32_0 = arith.constant 0 : i32
    %c0_i32_1 = arith.constant 0 : i32
    return %c0_i32, %c0_i32_0 : i32, i32
  }
  func.func @transform_3(%arg0: i32) -> (i32, i32) {
    %c0_i32 = arith.constant 0 : i32
    %c0_i32_0 = arith.constant 0 : i32
    %c0_i32_1 = arith.constant 0 : i32
    return %c0_i32, %c0_i32_0 : i32, i32
  }
  func.func @transform_4(%arg0: i32) -> (i32, i32) {
    %c0_i32 = arith.constant 0 : i32
    %c0_i32_0 = arith.constant 0 : i32
    %c0_i32_1 = arith.constant 0 : i32
    return %c0_i32, %c0_i32_0 : i32, i32
  }
  func.func @transform_5(%arg0: i32) -> (i32, i32) {
    %c0_i32 = arith.constant 0 : i32
    %c0_i32_0 = arith.constant 0 : i32
    %c0_i32_1 = arith.constant 0 : i32
    return %c0_i32, %c0_i32_0 : i32, i32
  }
  func.func @transform_6(%arg0: i32) -> (i32, i32) {
    %c0_i32 = arith.constant 0 : i32
    %c0_i32_0 = arith.constant 0 : i32
    %c0_i32_1 = arith.constant 0 : i32
    return %c0_i32, %c0_i32_0 : i32, i32
  }
  func.func @transform_7(%arg0: i32) -> (i32, i32) {
    %c0_i32 = arith.constant 0 : i32
    %c0_i32_0 = arith.constant 0 : i32
    return %arg0, %c0_i32 : i32, i32
  }
  func.func @transform_8(%arg0: i32) -> (i32, i32) {
    %c0_i32 = arith.constant 0 : i32
    %c0_i32_0 = arith.constant 0 : i32
    return %arg0, %c0_i32 : i32, i32
  }
}

</mosaic_0001>

<bundles_post_ra>
// kernel: tpu_custom_call.1
= control target key start
LH: loop header
LB: loop body
LE: loop exit
PB: predicated region body
PF: predicated region fallthrough
CT: control target
= control target key end

     0   :  { %14 = vsyncpa [#allocation3], 0  ;;  %s1314_s0 = inlined_call_operand.hbm [shape: bf16[16,128], index: 0, kind: input, shape index: {}]   ;;  %s1315_s1 = inlined_call_operand.hbm [shape: bf16[16,128], index: 1, kind: input, shape index: {}]   ;;  %s1316_s2 = inlined_call_operand.hbm [shape: bf16[128,128], index: 2, kind: input, shape index: {}]   ;;  %s1317_s3 = inlined_call_operand.hbm [shape: bf16[128,128], index: 3, kind: input, shape index: {}]   ;;  %s1318_s4 = inlined_call_operand.hbm [shape: bf16[128,128], index: 4, kind: input, shape index: {}]   ;;  %s1319_s5 = inlined_call_operand.hbm [shape: bf16[128,128], index: 5, kind: input, shape index: {}]   ;;  %s1320_s6 = inlined_call_operand.vmem [shape: f32[1,512], index: 6, kind: input, shape index: {}]   ;;  %s1321_s7 = inlined_call_operand.hbm [shape: bf16[16,128], index: 7, kind: output, shape index: {0}]   ;;  %s1322_s8 = inlined_call_operand.hbm [shape: f32[16,128], index: 8, kind: output, shape index: {1}]  }
   0x1   :  { %15 = vsyncpa [#allocation6], 0 }
   0x2   :  { %16 = vsyncpa [#allocation9], 0 }
   0x3   :  { %17 = vsyncpa [#allocation12], 0 }
   0x4   :  { %18 = vsyncpa [#allocation4], 0 }
   0x5   :  { %19 = vsyncpa [#allocation15], 0  ;;  %s1063_s27 = smov [#allocation5]   ;;  %s1064_s29 = smov [#allocation8]  }
   0x6   :  { %s37_s28 = sshll.u32 %s1063_s27, 4  ;;  %s61_s30 = sshll.u32 %s1064_s29, 4  ;;  %s38_s28 = int_to_ptr.vmem [resolvable:$true] %s37_s28  ;;  %s1122_s30 = int_to_ptr.vmem [resolvable:$true] %s61_s30 }
   0x7   :  { %s875_s11 = scalar_lea.hbm %s1315_s1, 128 }
   0x8   :  { %p876_p0 = scmp.ne.s32.totalorder %s1315_s1, %s875_s11  ;;  %p879_p1 = scmp.lt.u32.totalorder %s875_s11, %s1315_s1 }
   0xa   :  { %p881_p2 = pnand %p879_p1, %p876_p0 }
   0xc   :  { %884 = shalt.err (!%p881_p2)
}
   0xd   :  { %s885_s16 = scalar_lea.vmem %s38_s28, 128  ;;  %p890_p4 = scmp.lt.s32.totalorder %s38_s28, %s38_s28 }
   0xe   :  { %p886_p3 = scmp.ne.s32.totalorder %s38_s28, %s885_s16  ;;  %p891_p5 = scmp.lt.s32.totalorder %s885_s16, %s885_s16 }
  0x10   :  { %p892_p6 = por %p891_p5, %p890_p4 }
  0x12   :  { %p893_p7 = pnand %p892_p6, %p886_p3 }
  0x14   :  { %896 = shalt.err (!%p893_p7)
}
  0x15   :  { %s1065_s17 = smov 64   ;;  %s1066_s18 = smov 4  }
  0x16   :  { %43 = dma.hbm_to_vmem [thread:$0]  %s1315_s1, 128, %s38_s28, [#allocation6], %s1065_s17, %s1065_s17, %s1066_s18  }
  0x17   :  { %s897_s23 = scalar_lea.hbm %s1317_s3, 1024 }
  0x18   :  { %p898_p8 = scmp.ne.s32.totalorder %s1317_s3, %s897_s23  ;;  %p901_p9 = scmp.lt.u32.totalorder %s897_s23, %s1317_s3 }
  0x1a   :  { %p903_p10 = pnand %p901_p9, %p898_p8 }
  0x1c   :  { %906 = shalt.err (!%p903_p10)
}
  0x1d   :  { %s907_s29 = scalar_lea.vmem %s1122_s30, 1024  ;;  %p912_p12 = scmp.lt.s32.totalorder %s1122_s30, %s1122_s30 }
  0x1e   :  { %p908_p11 = scmp.ne.s32.totalorder %s1122_s30, %s907_s29  ;;  %p913_p13 = scmp.lt.s32.totalorder %s907_s29, %s907_s29 }
  0x20   :  { %p914_p0 = por %p913_p13, %p912_p12 }
  0x22   :  { %p915_p1 = pnand %p914_p0, %p908_p11 }
  0x24   :  { %918 = shalt.err (!%p915_p1)
}
  0x25   :  { %67 = dma.hbm_to_vmem [thread:$0]  %s1317_s3, 1024, %s1122_s30, [#allocation9], %s1065_s17, %s1065_s17, %s1066_s18  }
  0x26   :  { %s1067_s9 = smov [#allocation2]   ;;  %s1068_s11 = smov [#allocation7]  }
  0x27   :  { %s25_s10 = sshll.u32 %s1067_s9, 4  ;;  %s49_s12 = sshll.u32 %s1068_s11, 4  ;;  %s26_s10 = int_to_ptr.vmem [resolvable:$true] %s25_s10  ;;  %s1159_s12 = int_to_ptr.vmem [resolvable:$true] %s49_s12 }
  0x28   :  { %s919_s15 = scalar_lea.hbm %s1314_s0, 128 }
  0x29   :  { %p920_p2 = scmp.ne.s32.totalorder %s1314_s0, %s919_s15  ;;  %p923_p3 = scmp.lt.u32.totalorder %s919_s15, %s1314_s0 }
  0x2b   :  { %p925_p4 = pnand %p923_p3, %p920_p2 }
  0x2d   :  { %928 = shalt.err (!%p925_p4)
}
  0x2e   :  { %s929_s3 = scalar_lea.vmem %s26_s10, 128  ;;  %p934_p6 = scmp.lt.s32.totalorder %s26_s10, %s26_s10 }
  0x2f   :  { %p930_p5 = scmp.ne.s32.totalorder %s26_s10, %s929_s3  ;;  %p935_p7 = scmp.lt.s32.totalorder %s929_s3, %s929_s3 }
  0x31   :  { %p936_p8 = por %p935_p7, %p934_p6 }
  0x33   :  { %p937_p9 = pnand %p936_p8, %p930_p5 }
  0x35   :  { %940 = shalt.err (!%p937_p9)
}
  0x36   :  { %31 = dma.hbm_to_vmem [thread:$0]  %s1314_s0, 128, %s26_s10, [#allocation3], %s1065_s17, %s1065_s17, %s1066_s18  }
  0x37   :  { %s941_s25 = scalar_lea.hbm %s1316_s2, 1024 }
  0x38   :  { %p942_p10 = scmp.ne.s32.totalorder %s1316_s2, %s941_s25  ;;  %p945_p11 = scmp.lt.u32.totalorder %s941_s25, %s1316_s2 }
  0x3a   :  { %p947_p12 = pnand %p945_p11, %p942_p10 }
  0x3c   :  { %950 = shalt.err (!%p947_p12)
}
  0x3d   :  { %s951_s28 = scalar_lea.vmem %s1159_s12, 1024  ;;  %p956_p0 = scmp.lt.s32.totalorder %s1159_s12, %s1159_s12 }
  0x3e   :  { %p952_p13 = scmp.ne.s32.totalorder %s1159_s12, %s951_s28  ;;  %p957_p1 = scmp.lt.s32.totalorder %s951_s28, %s951_s28 }
  0x40   :  { %p958_p2 = por %p957_p1, %p956_p0 }
  0x42   :  { %p959_p3 = pnand %p958_p2, %p952_p13 }
  0x44   :  { %962 = shalt.err (!%p959_p3)
}
  0x45   :  { %55 = dma.hbm_to_vmem [thread:$0]  %s1316_s2, 1024, %s1159_s12, [#allocation6], %s1065_s17, %s1065_s17, %s1066_s18  }
  0x46   :  { %s1069_s10 = smov [#allocation10]   ;;  %s1070_s13 = smov [#allocation11]  }
  0x47   :  { %s73_s11 = sshll.u32 %s1069_s10, 4  ;;  %s85_s14 = sshll.u32 %s1070_s13, 4  ;;  %s74_s11 = int_to_ptr.vmem [resolvable:$true] %s73_s11  ;;  %s1196_s14 = int_to_ptr.vmem [resolvable:$true] %s85_s14 }
  0x48   :  { %s963_s19 = scalar_lea.hbm %s1318_s4, 1024 }
  0x49   :  { %p964_p4 = scmp.ne.s32.totalorder %s1318_s4, %s963_s19  ;;  %p967_p5 = scmp.lt.u32.totalorder %s963_s19, %s1318_s4 }
  0x4b   :  { %p969_p6 = pnand %p967_p5, %p964_p4 }
  0x4d   :  { %972 = shalt.err (!%p969_p6)
}
  0x4e   :  { %s973_s2 = scalar_lea.vmem %s74_s11, 1024  ;;  %p978_p8 = scmp.lt.s32.totalorder %s74_s11, %s74_s11 }
  0x4f   :  { %p974_p7 = scmp.ne.s32.totalorder %s74_s11, %s973_s2  ;;  %p979_p9 = scmp.lt.s32.totalorder %s973_s2, %s973_s2 }
  0x51   :  { %p980_p10 = por %p979_p9, %p978_p8 }
  0x53   :  { %p981_p11 = pnand %p980_p10, %p974_p7 }
  0x55   :  { %984 = shalt.err (!%p981_p11)
}
  0x56   :  { %79 = dma.hbm_to_vmem [thread:$0]  %s1318_s4, 1024, %s74_s11, [#allocation9], %s1065_s17, %s1065_s17, %s1066_s18  }
  0x57   :  { %s985_s25 = scalar_lea.hbm %s1319_s5, 1024 }
  0x58   :  { %p986_p12 = scmp.ne.s32.totalorder %s1319_s5, %s985_s25  ;;  %p989_p13 = scmp.lt.u32.totalorder %s985_s25, %s1319_s5 }
  0x5a   :  { %p991_p0 = pnand %p989_p13, %p986_p12 }
  0x5c   :  { %994 = shalt.err (!%p991_p0)
}
  0x5d   :  { %s995_s28 = scalar_lea.vmem %s1196_s14, 1024  ;;  %p1000_p2 = scmp.lt.s32.totalorder %s1196_s14, %s1196_s14 }
  0x5e   :  { %p996_p1 = scmp.ne.s32.totalorder %s1196_s14, %s995_s28  ;;  %p1001_p3 = scmp.lt.s32.totalorder %s995_s28, %s995_s28 }
  0x60   :  { %p1002_p4 = por %p1001_p3, %p1000_p2 }
  0x62   :  { %p1003_p5 = pnand %p1002_p4, %p996_p1 }
  0x64   :  { %1006 = shalt.err (!%p1003_p5)
}
  0x65   :  { %91 = dma.hbm_to_vmem [thread:$0]  %s1319_s5, 1024, %s1196_s14, [#allocation12], %s1065_s17, %s1065_s17, %s1066_s18  }
  0x66   :  { %1051 = dma.done.wait [#allocation3], 128  }
  0x67   :  { %1052 = vsyncadd [#allocation3], 4294967168 }
  0x68   :  { %1053 = dma.done.wait [#allocation6], 1152  }
  0x69   :  { %1054 = vsyncadd [#allocation6], 4294966144 }
  0x6a   :  { %1055 = dma.done.wait [#allocation9], 2048  }
  0x6b   :  { %1056 = vsyncadd [#allocation9], 4294965248 }
  0x6c   :  { %1057 = dma.done.wait [#allocation12], 1024  }
  0x6d   :  { %1058 = vsyncadd [#allocation12], 4294966272  ;;  %v1071_v0 = vmov 0.0   ;;  %vm1072_vm0 = vmmov 0   ;;  %v834_v1 = vld [vmem:[#allocation7] sm:$0xff]   ;;  %v835_v2 = vld [vmem:[#allocation7 + $0x8] sm:$0xff]  }
  0x6e   :  { %740 = vmatprep.subr.bf16.mxu0 %v1071_v0  ;;  %756 = vmatprep.mubr.msk.bf16.mxu0 %vm1072_vm0, %v1071_v0  ;;  %v836_v3 = vld [vmem:[#allocation7 + $0x10] sm:$0xff]   ;;  %v843_v4 = vld [vmem:[#allocation8] sm:$0xff]   ;;  %v837_v5 = vld [vmem:[#allocation7 + $0x18] sm:$0xff]   ;;  %s1073_s15 = smov [#allocation14]  }
  0x6f   :  { %760 = vmatprep.subr.bf16.mxu1 %v1071_v0  ;;  %776 = vmatprep.mubr.msk.bf16.mxu1 %vm1072_vm0, %v1071_v0  ;;  %v844_v6 = vld [vmem:[#allocation8 + $0x8] sm:$0xff]   ;;  %v838_v7 = vld [vmem:[#allocation7 + $0x20] sm:$0xff]   ;;  %v845_v8 = vld [vmem:[#allocation8 + $0x10] sm:$0xff]   ;;  %s635_s16 = sshll.u32 %s1073_s15, 4  ;;  %s636_s16 = int_to_ptr.vmem [resolvable:$true] %s635_s16 }
  0x70   :  { %741 = vmatpush3.bf16.msra.mxu0 %v834_v1  ;;  %761 = vmatpush3.bf16.msra.mxu1 %v843_v4  ;;  %v839_v9 = vld [vmem:[#allocation7 + $0x28] sm:$0xff]   ;;  %v846_v10 = vld [vmem:[#allocation8 + $0x18] sm:$0xff]   ;;  %v840_v11 = vld [vmem:[#allocation7 + $0x30] sm:$0xff]   ;;  %s1007_s19 = scalar_lea.vmem %s636_s16, 256  ;;  %p1012_p7 = scmp.lt.s32.totalorder %s636_s16, %s636_s16 }
  0x71   :  { %742 = vmatprep.subr.bf16.mxu0 %v1071_v0  ;;  %762 = vmatprep.subr.bf16.mxu1 %v1071_v0  ;;  %v847_v12 = vld [vmem:[#allocation8 + $0x20] sm:$0xff]   ;;  %v841_v13 = vld [vmem:[#allocation7 + $0x38] sm:$0xff]   ;;  %v848_v14 = vld [vmem:[#allocation8 + $0x28] sm:$0xff]   ;;  %p1008_p6 = scmp.ne.s32.totalorder %s636_s16, %s1007_s19  ;;  %p1013_p8 = scmp.lt.s32.totalorder %s1007_s19, %s1007_s19 }
  0x72   :  { %v842_v15 = vld [vmem:[#allocation2] sm:$0xff]   ;;  %v850_v17 = vld [vmem:[#allocation8 + $0x38] sm:$0xff]   ;;  %v851_v28 = vld [vmem:[#allocation10] sm:$0xff]  }
  0x73   :  { %v849_v16 = vld [vmem:[#allocation8 + $0x30] sm:$0xff]   ;;  %v852_v29 = vld [vmem:[#allocation10 + $0x8] sm:$0xff]   ;;  %v854_v31 = vld [vmem:[#allocation10 + $0x18] sm:$0xff]   ;;  %p1014_p9 = por %p1013_p8, %p1012_p7 }
  0x74   :  { %743 = vmatpush3.bf16.msra.mxu0 %v835_v2  ;;  %763 = vmatpush3.bf16.msra.mxu1 %v844_v6  ;;  %v654_v18 = vld [vmem:[%s1320_s6] ss:$0 sm:$0xff]  ;;  %v855_v32 = vld [vmem:[#allocation10 + $0x20] sm:$0xff]   ;;  %v856_v33 = vld [vmem:[#allocation10 + $0x28] sm:$0xff]  }
  0x75   :  { %744 = vmatprep.subr.bf16.mxu0 %v1071_v0  ;;  %764 = vmatprep.subr.bf16.mxu1 %v1071_v0  ;;  %v853_v30 = vld [vmem:[#allocation10 + $0x10] sm:$0xff]   ;;  %v696_v46 = vld [vmem:[#allocation5] sm:$0xff]   ;;  %v859_v50 = vld [vmem:[#allocation11] sm:$0xff]   ;;  %p1015_p10 = pnand %p1014_p9, %p1008_p6 }
  0x76   :  { %v664_v34 = vld [vmem:[%s1320_s6 + $0x1] ss:$0 sm:$0xff]  ;;  %v858_v47 = vld [vmem:[#allocation10 + $0x38] sm:$0xff]   ;;  %v697_v48 = vunpack.c.l.bf16 %v696_v46  ;;  %v698_v49 = vunpack.c.h.bf16 %v696_v46  ;;  %v860_v53 = vld [vmem:[#allocation11 + $0x8] sm:$0xff]  }
  0x77   :  { %v857_v45 = vld [vmem:[#allocation10 + $0x30] sm:$0xff]   ;;  %v862_v59 = vld [vmem:[#allocation11 + $0x18] sm:$0xff]   ;;  %v863_v60 = vld [vmem:[#allocation11 + $0x20] sm:$0xff]  }
  0x78   :  { %745 = vmatpush3.bf16.msra.mxu0 %v836_v3  ;;  %765 = vmatpush3.bf16.msra.mxu1 %v845_v8  ;;  %vm356_vm1 = vcmp.eq.f32.partialorder %v697_v48, 0.0  ;;  %vm357_vm2 = vcmp.eq.f32.partialorder %v698_v49, 0.0  ;;  %v861_v57 = vld [vmem:[#allocation11 + $0x10] sm:$0xff]   ;;  %v864_v61 = vld [vmem:[#allocation11 + $0x28] sm:$0xff]  }
  0x79   :  { %746 = vmatprep.subr.bf16.mxu0 %v1071_v0  ;;  %766 = vmatprep.subr.bf16.mxu1 %v1071_v0  ;;  %v865_v4 = vld [vmem:[#allocation11 + $0x30] sm:$0xff]  }
  0x7a   :  { %v673_v6 = vld [vmem:[%s1320_s6 + $0x2] ss:$0 sm:$0xff] }
  0x7c   :  { %747 = vmatpush3.bf16.msra.mxu0 %v837_v5  ;;  %767 = vmatpush3.bf16.msra.mxu1 %v846_v10  ;;  %v866_v5 = vld [vmem:[#allocation11 + $0x38] sm:$0xff]  }
  0x7d   :  { %748 = vmatprep.subr.bf16.mxu0 %v1071_v0  ;;  %768 = vmatprep.subr.bf16.mxu1 %v1071_v0 }
  0x80   :  { %749 = vmatpush3.bf16.msra.mxu0 %v838_v7  ;;  %769 = vmatpush3.bf16.msra.mxu1 %v847_v12 }
  0x81   :  { %750 = vmatprep.subr.bf16.mxu0 %v1071_v0  ;;  %770 = vmatprep.subr.bf16.mxu1 %v1071_v0 }
  0x84   :  { %751 = vmatpush3.bf16.msra.mxu0 %v839_v9  ;;  %771 = vmatpush3.bf16.msra.mxu1 %v848_v14 }
  0x85   :  { %752 = vmatprep.subr.bf16.mxu0 %v1071_v0  ;;  %772 = vmatprep.subr.bf16.mxu1 %v1071_v0 }
  0x88   :  { %753 = vmatpush3.bf16.msra.mxu0 %v840_v11  ;;  %773 = vmatpush3.bf16.msra.mxu1 %v849_v16 }
  0x89   :  { %754 = vmatprep.subr.bf16.mxu0 %v1071_v0  ;;  %774 = vmatprep.subr.bf16.mxu1 %v1071_v0 }
  0x8c   :  { %755 = vmatpush3.bf16.msra.mxu0 %v841_v13  ;;  %775 = vmatpush3.bf16.msra.mxu1 %v850_v17 }
  0x8d   :  { %780 = vmatprep.subr.bf16.mxu0 %v1071_v0  ;;  %800 = vmatprep.subr.bf16.mxu1 %v1071_v0 }
  0x8f   :  { %757 = vmatmul.mubr.bf16.vlgmr.msra.gmra.mrb[0].mxu0 %v842_v15 }
  0x90   :  { %796 = vmatprep.mubr.msk.bf16.mxu0 %vm1072_vm0, %v1071_v0  ;;  %781 = vmatpush3.bf16.msra.mxu0 %v851_v28 }
  0x91   :  { %782 = vmatprep.subr.bf16.mxu0 %v1071_v0 }
  0x94   :  { %783 = vmatpush3.bf16.msra.mxu0 %v852_v29 }
  0x95   :  { %784 = vmatprep.subr.bf16.mxu0 %v1071_v0 }
  0x98   :  { %785 = vmatpush3.bf16.msra.mxu0 %v853_v30 }
  0x99   :  { %786 = vmatprep.subr.bf16.mxu0 %v1071_v0 }
  0x9c   :  { %787 = vmatpush3.bf16.msra.mxu0 %v854_v31 }
  0x9d   :  { %788 = vmatprep.subr.bf16.mxu0 %v1071_v0 }
  0xa0   :  { %789 = vmatpush3.bf16.msra.mxu0 %v855_v32 }
  0xa1   :  { %790 = vmatprep.subr.bf16.mxu0 %v1071_v0 }
  0xa4   :  { %791 = vmatpush3.bf16.msra.mxu0 %v856_v33 }
  0xa5   :  { %792 = vmatprep.subr.bf16.mxu0 %v1071_v0 }
  0xa8   :  { %793 = vmatpush3.bf16.msra.mxu0 %v857_v45 }
  0xa9   :  { %794 = vmatprep.subr.bf16.mxu0 %v1071_v0 }
  0xac   :  { %795 = vmatpush3.bf16.msra.mxu0 %v858_v47 }
 0x162   :  { %v229_v19 = vpop.f32.mrb[0].mxu0 }
 0x163   :  { %v230_v20 = vadd.f32 %v654_v18, %v229_v19  ;;  %v758_v21 = vpop.f32.mrb[1].mxu0 }
 0x164   :  { %v232_v22 = vpop.f32.mrb[2].mxu0 }
 0x165   :  { %v233_v23 = vadd.f32 %v654_v18, %v232_v22  ;;  %v759_v24 = vpop.f32.mrb[3].mxu0  ;;  %v236_v25 = vmax.f32 %v230_v20, 0.0 }
 0x167   :  { %v237_v26 = vmax.f32 %v233_v23, 0.0 }
 0x169   :  { %v238_v27 = vpack.c.bf16 %v237_v26, %v236_v25 }
 0x16b   :  { %777 = vmatmul.mubr.bf16.vlgmr.msra.gmra.mrb[0].mxu1 %v238_v27 }
 0x16c   :  { %816 = vmatprep.mubr.msk.bf16.mxu1 %vm1072_vm0, %v1071_v0  ;;  %801 = vmatpush3.bf16.msra.mxu1 %v859_v50 }
 0x16d   :  { %802 = vmatprep.subr.bf16.mxu1 %v1071_v0 }
 0x170   :  { %803 = vmatpush3.bf16.msra.mxu1 %v860_v53 }
 0x171   :  { %804 = vmatprep.subr.bf16.mxu1 %v1071_v0 }
 0x174   :  { %805 = vmatpush3.bf16.msra.mxu1 %v861_v57 }
 0x175   :  { %806 = vmatprep.subr.bf16.mxu1 %v1071_v0 }
 0x178   :  { %807 = vmatpush3.bf16.msra.mxu1 %v862_v59 }
 0x179   :  { %808 = vmatprep.subr.bf16.mxu1 %v1071_v0 }
 0x17c   :  { %809 = vmatpush3.bf16.msra.mxu1 %v863_v60 }
 0x17d   :  { %810 = vmatprep.subr.bf16.mxu1 %v1071_v0 }
 0x180   :  { %811 = vmatpush3.bf16.msra.mxu1 %v864_v61 }
 0x181   :  { %812 = vmatprep.subr.bf16.mxu1 %v1071_v0 }
 0x184   :  { %813 = vmatpush3.bf16.msra.mxu1 %v865_v4 }
 0x185   :  { %814 = vmatprep.subr.bf16.mxu1 %v1071_v0 }
 0x188   :  { %815 = vmatpush3.bf16.msra.mxu1 %v866_v5 }
 0x23e   :  { %v343_v35 = vpop.f32.mrb[0].mxu1 }
 0x23f   :  { %v344_v36 = vadd.f32 %v664_v34, %v343_v35  ;;  %v778_v37 = vpop.f32.mrb[1].mxu1 }
 0x240   :  { %v346_v38 = vpop.f32.mrb[2].mxu1 }
 0x241   :  { %350 = vst [vmem:[#allocation14] sm:$0xff] %v344_v36  ;;  %v358_v39 = vmul.f32 0.5, %v344_v36  ;;  %v347_v40 = vadd.f32 %v664_v34, %v346_v38  ;;  %v779_v41 = vpop.f32.mrb[3].mxu1 }
 0x243   :  { %v360_v42 = vmul.f32 1.442695, %v358_v39  ;;  %351 = vst [vmem:[#allocation14 + $0x8] sm:$0xff] %v347_v40  ;;  %v359_v43 = vmul.f32 0.5, %v347_v40 }
 0x245   :  { %867 = vpow2.f32 %v360_v42  ;;  %v362_v44 = vmul.f32 1.442695, %v359_v43 }
 0x247   :  { %869 = vpow2.f32 %v362_v44 }
 0x24f   :  { %v868_v51 = vpop.eup %867 }
 0x250   :  { %v364_v52 = vmul.f32 %v868_v51, %v697_v48 }
 0x251   :  { %v870_v54 = vpop.eup %869 }
 0x252   :  { %v366_v55 = vsel %vm356_vm1, 0.0, %v364_v52  ;;  %v365_v56 = vmul.f32 %v870_v54, %v698_v49 }
 0x253   :  { %368 = vrot.lane.b32.xlu0 %v366_v55, %s1065_s17 }
 0x254   :  { %v367_v58 = vsel %vm357_vm2, 0.0, %v365_v56 }
 0x257   :  { %370 = vrot.lane.b32.xlu0 %v367_v58, %s1065_s17 }
 0x2c5   :  { %v369_v62 = vpop.permute.xlu0 %368 }
 0x2c6   :  { %v372_v1 = vadd.f32 %v369_v62, %v344_v36 }
 0x2c9   :  { %v371_v63 = vpop.permute.xlu0 %370 }
 0x2ca   :  { %v373_v2 = vadd.f32 %v371_v63, %v347_v40 }
 0x2cc   :  { %v374_v3 = vpack.c.bf16 %v373_v2, %v372_v1 }
 0x2ce   :  { %797 = vmatmul.mubr.bf16.vlgmr.msra.gmra.mrb[4].mxu0 %v374_v3 }
 0x3a1   :  { %v479_v7 = vpop.f32.mrb[4].mxu0 }
 0x3a2   :  { %v480_v8 = vadd.f32 %v673_v6, %v479_v7  ;;  %v798_v9 = vpop.f32.mrb[5].mxu0 }
 0x3a3   :  { %v482_v10 = vpop.f32.mrb[6].mxu0 }
 0x3a4   :  { %v483_v11 = vadd.f32 %v673_v6, %v482_v10  ;;  %v799_v12 = vpop.f32.mrb[7].mxu0  ;;  %v486_v13 = vmax.f32 %v480_v8, 0.0 }
 0x3a6   :  { %v487_v14 = vmax.f32 %v483_v11, 0.0 }
 0x3a8   :  { %v488_v15 = vpack.c.bf16 %v487_v14, %v486_v13 }
 0x3aa   :  { %817 = vmatmul.mubr.bf16.vlgmr.msra.gmra.mrb[4].mxu1 %v488_v15 }
 0x3ab   :  { %1018 = shalt.err (!%p1015_p10)
}
 0x3ac   :  { %s1019_s3 = scalar_lea.hbm %s1322_s8, 256 }
 0x3ad   :  { %p1020_p11 = scmp.ne.s32.totalorder %s1322_s8, %s1019_s3  ;;  %p1023_p12 = scmp.lt.u32.totalorder %s1019_s3, %s1322_s8 }
 0x3af   :  { %p1025_p13 = pnand %p1023_p12, %p1020_p11 }
 0x3b1   :  { %1028 = shalt.err (!%p1025_p13)
}
 0x3b2   :  { %s1074_s23 = smov 128   ;;  %s1075_s24 = smov 8   ;;  %v682_v0 = vld [vmem:[%s1320_s6 + $0x3] ss:$0 sm:$0xff] }
 0x3b3   :  { %641 = dma.vmem_to_hbm [thread:$0]  %s636_s16, 256, %s1322_s8, [#allocation15], %s1074_s23, %s1074_s23, %s1075_s24  }
 0x3b4   :  { %s1076_s1 = smov [#allocation13]  }
 0x3b5   :  { %s623_s8 = sshll.u32 %s1076_s1, 4  ;;  %s624_s8 = int_to_ptr.vmem [resolvable:$true] %s623_s8 }
 0x3b6   :  { %s1029_s6 = scalar_lea.vmem %s624_s8, 128  ;;  %p1034_p1 = scmp.lt.s32.totalorder %s624_s8, %s624_s8 }
 0x3b7   :  { %p1030_p0 = scmp.ne.s32.totalorder %s624_s8, %s1029_s6  ;;  %p1035_p2 = scmp.lt.s32.totalorder %s1029_s6, %s1029_s6 }
 0x3b9   :  { %p1036_p3 = por %p1035_p2, %p1034_p1 }
 0x3bb   :  { %p1037_p4 = pnand %p1036_p3, %p1030_p0 }
 0x47d   :  { %v593_v16 = vpop.f32.mrb[4].mxu1 }
 0x47e   :  { %v594_v17 = vadd.f32 %v682_v0, %v593_v16  ;;  %v818_v18 = vpop.f32.mrb[5].mxu1 }
 0x47f   :  { %v596_v19 = vpop.f32.mrb[6].mxu1 }
 0x480   :  { %v600_v20 = vmul.f32 0.5, %v594_v17  ;;  %v597_v21 = vadd.f32 %v682_v0, %v596_v19  ;;  %v819_v22 = vpop.f32.mrb[7].mxu1 }
 0x482   :  { %871 = vtanh.f32 %v600_v20  ;;  %v601_v23 = vmul.f32 0.5, %v597_v21 }
 0x484   :  { %873 = vtanh.f32 %v601_v23 }
 0x48c   :  { %v872_v24 = vpop.eup %871 }
 0x48d   :  { %v604_v25 = vadd.f32 1.0, %v872_v24 }
 0x48e   :  { %v874_v26 = vpop.eup %873 }
 0x48f   :  { %v605_v27 = vadd.f32 1.0, %v874_v26  ;;  %v606_v28 = vmul.f32 0.5, %v604_v25 }
 0x491   :  { %v607_v29 = vmul.f32 0.5, %v605_v27 }
 0x493   :  { %v702_v30 = vpack.c.bf16 %v607_v29, %v606_v28 }
 0x495   :  { %703 = vst [vmem:[#allocation13] sm:$0xff] %v702_v30  }
 0x496   :  { %1040 = shalt.err (!%p1037_p4)
}
 0x497   :  { %s1041_s0 = scalar_lea.hbm %s1321_s7, 128 }
 0x498   :  { %p1042_p5 = scmp.ne.s32.totalorder %s1321_s7, %s1041_s0  ;;  %p1045_p6 = scmp.lt.u32.totalorder %s1041_s0, %s1321_s7 }
 0x49a   :  { %p1047_p7 = pnand %p1045_p6, %p1042_p5 }
 0x49c   :  { %1050 = shalt.err (!%p1047_p7)
}
 0x49d   :  { %629 = dma.vmem_to_hbm [thread:$0]  %s624_s8, 128, %s1321_s7, [#allocation4], %s1065_s17, %s1065_s17, %s1066_s18  }
 0x49e   :  { %1059 = dma.done.wait [#allocation4], 128  }
 0x49f   :  { %1060 = vsyncadd [#allocation4], 4294967168 }
 0x4a0   :  { %1061 = dma.done.wait [#allocation15], 256  }
 0x4a1   :  { %1062 = vsyncadd [#allocation15], 4294967040 }
 0x4a2   :  { %648 = vsyncpa [#allocation3], 1 }
 0x4a3   :  { %649 = vsyncpa [#allocation6], 1 }
 0x4a4   :  { %650 = vsyncpa [#allocation9], 1 }
 0x4a5   :  { %651 = vsyncpa [#allocation12], 1 }
 0x4a6   :  { %652 = vsyncpa [#allocation4], 1 }
 0x4a7   :  { %653 = vsyncpa [#allocation15], 1 }

</bundles_post_ra>
